<compile_context>
chip_gen: v7x
topology: tpu7x:2x2x1
jax: 0.10.0
libtpu: 0.0.40
codegen_flags: <defaults>
</compile_context>

<pallas_src>
import jax
import jax.numpy as jnp
from jax.experimental import pallas as pl
from jax.experimental.pallas import tpu as pltpu

IN_DIM = 4         # CartPole observation size
OUT_DIM = 2        # number of actions
HID = 128          # hidden width
PAD = 128          # lane-aligned logits width (logits live in cols 0..1)
MAX_TILE_B = 2048  # batch rows per grid step


def policy_mlp_kernel(x_ref, w1_ref, b1_ref, w2_ref, b2_ref, w3_ref, b3_ref,
                      o_ref):
    # Layer 1: Linear(4 -> 128) + ReLU.  f32 matmul, K=4 (MXU pads K internally).
    h1 = jnp.dot(x_ref[...], w1_ref[...],
                 preferred_element_type=jnp.float32) + b1_ref[...]
    h1 = jnp.maximum(h1, 0.0)
    # Dropout(0.1): identity at inference.

    # Layer 2: Linear(128 -> 128) + ReLU.  bf16 operands, f32 accumulation.
    h2 = jnp.dot(h1.astype(jnp.bfloat16), w2_ref[...],
                 preferred_element_type=jnp.float32) + b2_ref[...]
    h2b = jnp.maximum(h2, 0.0).astype(jnp.bfloat16)
    # Dropout(0.1): identity at inference.

    # Layer 3: Linear(128 -> 2); w3 is lane-padded to 128 cols (zeros past 2).
    logits = jnp.dot(h2b, w3_ref[...],
                     preferred_element_type=jnp.float32) + b3_ref[...]

    # 2-class softmax closed form on the narrow (TB, 2) output tile:
    #   p0 = sigmoid(l0 - l1), p1 = sigmoid(l1 - l0) = 1 - p0.
    d = logits[:, 0:1] - logits[:, 1:2]                        # (TB, 1) f32
    col = jax.lax.broadcasted_iota(jnp.int32, o_ref.shape, 1)  # (TB, 2)
    signed = jnp.where(col == 0, 1.0, -1.0) * jnp.broadcast_to(d, o_ref.shape)
    o_ref[...] = 1.0 / (1.0 + jnp.exp(-signed))                # exp -> EUP


def _orthogonal(key, out_dim, in_dim):
    """Deterministic orthogonal init (semantics of nn.init.orthogonal_, gain=1)."""
    n, m = out_dim, in_dim
    a = jax.random.normal(key, (max(n, m), min(n, m)), jnp.float32)
    q, r = jnp.linalg.qr(a)
    q = q * jnp.sign(jnp.diagonal(r))[None, :]
    if n < m:
        q = q.T
    return q[:n, :m]


def make_params(key):
    k1, k2, k3 = jax.random.split(key, 3)
    w1 = _orthogonal(k1, HID, IN_DIM)      # (128, 4)   PyTorch (out, in)
    w2 = _orthogonal(k2, HID, HID)         # (128, 128)
    w3 = _orthogonal(k3, OUT_DIM, HID)     # (2, 128)

    # Kernel-side layout: y = x @ W.T + b.
    w1t = w1.T                                                      # (4, 128) f32
    w2t = w2.T.astype(jnp.bfloat16)                                 # (128, 128) bf16
    w3t = (jnp.zeros((HID, PAD), jnp.float32).at[:, :OUT_DIM].set(w3.T)
           .astype(jnp.bfloat16))                                   # (128, 128) bf16
    # Biases are zero-initialized per the PyTorch init; kept f32 (1, lanes).
    b1p = jnp.zeros((1, HID), jnp.float32)
    b2p = jnp.zeros((1, HID), jnp.float32)
    b3p = jnp.zeros((1, PAD), jnp.float32)
    return w1t, b1p, w2t, b2p, w3t, b3p


def _round_up(n, m):
    return ((n + m - 1) // m) * m


def policy_forward(x, params):
    """x: (B, 4) float32 -> probs: (B, 2) float32."""
    w1t, b1p, w2t, b2p, w3t, b3p = params
    B = x.shape[0]

    # Tile selection: cap at MAX_TILE_B, force >= 2 grid steps for B > 8 so
    # both v7x TensorCores get work, and size the tile to cdiv(B, grid) so row
    # padding stays minimal.  Tiny batches stay single-step (latency path).
    grid_n = max(1, pl.cdiv(B, MAX_TILE_B))
    if grid_n == 1 and B > 8:
        grid_n = 2
    tile_b = max(8, _round_up(pl.cdiv(B, grid_n), 8))
    B_pad = tile_b * grid_n

    x = x.astype(jnp.float32)
    if B_pad != B:
        x = jnp.pad(x, ((0, B_pad - B), (0, 0)))   # row padding only, when needed

    flops = 2 * B_pad * (IN_DIM * HID + HID * HID + HID * PAD)
    bytes_accessed = (B_pad * IN_DIM * 4 + w1t.size * 4 + w2t.size * 2 +
                      w3t.size * 2 +
                      (b1p.size + b2p.size + b3p.size) * 4 +
                      B_pad * OUT_DIM * 4)

    out = pl.pallas_call(
        policy_mlp_kernel,
        out_shape=jax.ShapeDtypeStruct((B_pad, OUT_DIM), jnp.float32),
        grid=(grid_n,),
        in_specs=[
            pl.BlockSpec((tile_b, IN_DIM), lambda i: (i, 0)),   # x  (last dim full)
            pl.BlockSpec((IN_DIM, HID), lambda i: (0, 0)),      # w1 (f32, 4x128)
            pl.BlockSpec((1, HID), lambda i: (0, 0)),           # b1
            pl.BlockSpec((HID, HID), lambda i: (0, 0)),         # w2 (bf16)
            pl.BlockSpec((1, HID), lambda i: (0, 0)),           # b2
            pl.BlockSpec((HID, PAD), lambda i: (0, 0)),         # w3 (bf16)
            pl.BlockSpec((1, PAD), lambda i: (0, 0)),           # b3
        ],
        out_specs=pl.BlockSpec((tile_b, OUT_DIM), lambda i: (i, 0)),
        compiler_params=pltpu.CompilerParams(
            dimension_semantics=("parallel",)),
        cost_estimate=pl.CostEstimate(
            flops=flops, transcendentals=2 * B_pad,
            bytes_accessed=bytes_accessed),
    )(x, w1t, b1p, w2t, b2p, w3t, b3p)
    return out[:B]


if __name__ == "__main__":
    key = jax.random.PRNGKey(0)
    kx, kp = jax.random.split(key)
    params = make_params(kp)

    # Pure-JAX reference (same weight values, full f32 activations).
    def ref_forward(xb):
        w1t, b1p, w2t, b2p, w3t, b3p = params
        h1 = jnp.maximum(xb @ w1t + b1p, 0.0)
        h2 = jnp.maximum(h1 @ w2t.astype(jnp.float32) + b2p, 0.0)
        lg = (h2 @ w3t.astype(jnp.float32) + b3p)[:, :OUT_DIM]
        return jax.nn.softmax(lg, axis=-1)

    # B=8: single-step grid.  B=20: 2-step grid with ragged row padding.
    for B in (8, 20):
        x = jax.random.normal(jax.random.fold_in(kx, B), (B, IN_DIM),
                              jnp.float32)
        probs = jax.block_until_ready(policy_forward(x, params))
        ref = ref_forward(x)

        assert probs.shape == (B, OUT_DIM)
        assert bool(jnp.all(jnp.isfinite(probs)))
        assert bool(jnp.allclose(jnp.sum(probs, axis=-1), 1.0, atol=1e-5))
        # Loose tolerance: kernel uses bf16 hidden activations, reference is f32.
        assert bool(jnp.allclose(probs, ref, atol=2e-2))

    print("KERNEL_OK")
</pallas_src>

<mosaic_0001>
module attributes {stable_mosaic.version = 11 : i64} {
  func.func @policy_mlp_kernel(%arg0: i32, %arg1: memref<8x4xf32, #tpu.memory_space<vmem>>, %arg2: memref<4x128xf32, #tpu.memory_space<vmem>>, %arg3: memref<1x128xf32, #tpu.memory_space<vmem>>, %arg4: memref<128x128xbf16, #tpu.memory_space<vmem>>, %arg5: memref<1x128xf32, #tpu.memory_space<vmem>>, %arg6: memref<128x128xbf16, #tpu.memory_space<vmem>>, %arg7: memref<1x128xf32, #tpu.memory_space<vmem>>, %arg8: memref<8x2xf32, #tpu.memory_space<vmem>>) attributes {dimension_semantics = [#tpu.dimension_semantics<parallel>], iteration_bounds = array<i64: 1>, scalar_prefetch = 0 : i64, scratch_operands = 0 : i64, tpu.core_type = #tpu.core_type<tc>, window_params = [{transform_indices = @transform_0, window_bounds = array<i64: 8, 4>}, {pipeline_mode = #tpu.pipeline_mode<synchronous>, transform_indices = @transform_1, window_bounds = array<i64: 4, 128>}, {pipeline_mode = #tpu.pipeline_mode<synchronous>, transform_indices = @transform_2, window_bounds = array<i64: 1, 128>}, {pipeline_mode = #tpu.pipeline_mode<synchronous>, transform_indices = @transform_3, window_bounds = array<i64: 128, 128>}, {pipeline_mode = #tpu.pipeline_mode<synchronous>, transform_indices = @transform_4, window_bounds = array<i64: 1, 128>}, {pipeline_mode = #tpu.pipeline_mode<synchronous>, transform_indices = @transform_5, window_bounds = array<i64: 128, 128>}, {pipeline_mode = #tpu.pipeline_mode<synchronous>, transform_indices = @transform_6, window_bounds = array<i64: 1, 128>}, {transform_indices = @transform_7, window_bounds = array<i64: 8, 2>}]} {
    %c0 = arith.constant 0 : index
    %c0_0 = arith.constant 0 : index
    %0 = vector.load %arg1[%c0, %c0_0] : memref<8x4xf32, #tpu.memory_space<vmem>>, vector<8x4xf32>
    %c0_1 = arith.constant 0 : index
    %c0_2 = arith.constant 0 : index
    %1 = vector.load %arg2[%c0_1, %c0_2] : memref<4x128xf32, #tpu.memory_space<vmem>>, vector<4x128xf32>
    %cst = arith.constant dense<0.000000e+00> : vector<8x128xf32>
    %2 = tpu.matmul %0, %1, %cst {dimension_numbers = #tpu.dot_dimension_numbers<[1], [0], [0], [1], [0, 0, 1, 1], [], []>} : vector<8x4xf32>, vector<4x128xf32>, vector<8x128xf32> -> vector<8x128xf32>
    %c0_3 = arith.constant 0 : index
    %c0_4 = arith.constant 0 : index
    %3 = vector.load %arg3[%c0_3, %c0_4] : memref<1x128xf32, #tpu.memory_space<vmem>>, vector<1x128xf32>
    %4 = vector.broadcast %3 : vector<1x128xf32> to vector<8x128xf32>
    %5 = arith.addf %2, %4 : vector<8x128xf32>
    %cst_5 = arith.constant 0.000000e+00 : f32
    %6 = vector.broadcast %cst_5 : f32 to vector<8x128xf32>
    %7 = arith.maximumf %5, %6 : vector<8x128xf32>
    %8 = arith.truncf %7 : vector<8x128xf32> to vector<8x128xbf16>
    %c0_6 = arith.constant 0 : index
    %c0_7 = arith.constant 0 : index
    %9 = vector.load %arg4[%c0_6, %c0_7] : memref<128x128xbf16, #tpu.memory_space<vmem>>, vector<128x128xbf16>
    %cst_8 = arith.constant dense<0.000000e+00> : vector<8x128xf32>
    %10 = tpu.matmul %8, %9, %cst_8 {dimension_numbers = #tpu.dot_dimension_numbers<[1], [0], [0], [1], [0, 0, 1, 1], [], []>} : vector<8x128xbf16>, vector<128x128xbf16>, vector<8x128xf32> -> vector<8x128xf32>
    %c0_9 = arith.constant 0 : index
    %c0_10 = arith.constant 0 : index
    %11 = vector.load %arg5[%c0_9, %c0_10] : memref<1x128xf32, #tpu.memory_space<vmem>>, vector<1x128xf32>
    %12 = vector.broadcast %11 : vector<1x128xf32> to vector<8x128xf32>
    %13 = arith.addf %10, %12 : vector<8x128xf32>
    %cst_11 = arith.constant 0.000000e+00 : f32
    %14 = vector.broadcast %cst_11 : f32 to vector<8x128xf32>
    %15 = arith.maximumf %13, %14 : vector<8x128xf32>
    %16 = arith.truncf %15 : vector<8x128xf32> to vector<8x128xbf16>
    %c0_12 = arith.constant 0 : index
    %c0_13 = arith.constant 0 : index
    %17 = vector.load %arg6[%c0_12, %c0_13] : memref<128x128xbf16, #tpu.memory_space<vmem>>, vector<128x128xbf16>
    %cst_14 = arith.constant dense<0.000000e+00> : vector<8x128xf32>
    %18 = tpu.matmul %16, %17, %cst_14 {dimension_numbers = #tpu.dot_dimension_numbers<[1], [0], [0], [1], [0, 0, 1, 1], [], []>} : vector<8x128xbf16>, vector<128x128xbf16>, vector<8x128xf32> -> vector<8x128xf32>
    %c0_15 = arith.constant 0 : index
    %c0_16 = arith.constant 0 : index
    %19 = vector.load %arg7[%c0_15, %c0_16] : memref<1x128xf32, #tpu.memory_space<vmem>>, vector<1x128xf32>
    %20 = vector.broadcast %19 : vector<1x128xf32> to vector<8x128xf32>
    %21 = arith.addf %18, %20 : vector<8x128xf32>
    %22 = vector.extract_strided_slice %21 {offsets = [0, 0], sizes = [8, 1], strides = [1, 1]} : vector<8x128xf32> to vector<8x1xf32>
    %23 = vector.extract_strided_slice %21 {offsets = [0, 1], sizes = [8, 1], strides = [1, 1]} : vector<8x128xf32> to vector<8x1xf32>
    %24 = arith.subf %22, %23 : vector<8x1xf32>
    %25 = tpu.iota {dimensions = array<i32: 1>} : vector<8x2xi32>
    %c0_i32 = arith.constant 0 : i32
    %26 = vector.broadcast %c0_i32 : i32 to vector<8x2xi32>
    %27 = arith.cmpi eq, %25, %26 : vector<8x2xi32>
    %cst_17 = arith.constant 1.000000e+00 : f32
    %cst_18 = arith.constant -1.000000e+00 : f32
    %28 = vector.broadcast %cst_17 : f32 to vector<8x2xf32>
    %29 = vector.broadcast %cst_18 : f32 to vector<8x2xf32>
    %30 = arith.select %27, %28, %29 : vector<8x2xi1>, vector<8x2xf32>
    %31 = vector.shape_cast %24 : vector<8x1xf32> to vector<8x1xf32>
    %32 = vector.broadcast %31 : vector<8x1xf32> to vector<8x2xf32>
    %33 = arith.mulf %30, %32 : vector<8x2xf32>
    %cst_19 = arith.constant 0.000000e+00 : f32
    %34 = vector.broadcast %cst_19 : f32 to vector<8x2xf32>
    %35 = arith.subf %34, %33 : vector<8x2xf32>
    %36 = math.exp %35 : vector<8x2xf32>
    %cst_20 = arith.constant 1.000000e+00 : f32
    %37 = vector.broadcast %cst_20 : f32 to vector<8x2xf32>
    %38 = arith.addf %37, %36 : vector<8x2xf32>
    %cst_21 = arith.constant 1.000000e+00 : f32
    %39 = vector.broadcast %cst_21 : f32 to vector<8x2xf32>
    %40 = arith.divf %39, %38 : vector<8x2xf32>
    %c0_22 = arith.constant 0 : index
    %c0_23 = arith.constant 0 : index
    %41 = vector.load %arg8[%c0_22, %c0_23] : memref<8x2xf32, #tpu.memory_space<vmem>>, vector<8x2xf32>
    tpu.vector_store %arg8[%c0_22, %c0_23], %40 {strides = array<i32>} : memref<8x2xf32, #tpu.memory_space<vmem>>, vector<8x2xf32>,
    return
  }
  func.func @transform_0(%arg0: i32) -> (i32, i32) {
    %c0_i32 = arith.constant 0 : i32
    %c0_i32_0 = arith.constant 0 : i32
    return %arg0, %c0_i32 : i32, i32
  }
  func.func @transform_1(%arg0: i32) -> (i32, i32) {
    %c0_i32 = arith.constant 0 : i32
    %c0_i32_0 = arith.constant 0 : i32
    %c0_i32_1 = arith.constant 0 : i32
    return %c0_i32, %c0_i32_0 : i32, i32
  }
  func.func @transform_2(%arg0: i32) -> (i32, i32) {
    %c0_i32 = arith.constant 0 : i32
    %c0_i32_0 = arith.constant 0 : i32
    %c0_i32_1 = arith.constant 0 : i32
    return %c0_i32, %c0_i32_0 : i32, i32
  }
  func.func @transform_3(%arg0: i32) -> (i32, i32) {
    %c0_i32 = arith.constant 0 : i32
    %c0_i32_0 = arith.constant 0 : i32
    %c0_i32_1 = arith.constant 0 : i32
    return %c0_i32, %c0_i32_0 : i32, i32
  }
  func.func @transform_4(%arg0: i32) -> (i32, i32) {
    %c0_i32 = arith.constant 0 : i32
    %c0_i32_0 = arith.constant 0 : i32
    %c0_i32_1 = arith.constant 0 : i32
    return %c0_i32, %c0_i32_0 : i32, i32
  }
  func.func @transform_5(%arg0: i32) -> (i32, i32) {
    %c0_i32 = arith.constant 0 : i32
    %c0_i32_0 = arith.constant 0 : i32
    %c0_i32_1 = arith.constant 0 : i32
    return %c0_i32, %c0_i32_0 : i32, i32
  }
  func.func @transform_6(%arg0: i32) -> (i32, i32) {
    %c0_i32 = arith.constant 0 : i32
    %c0_i32_0 = arith.constant 0 : i32
    %c0_i32_1 = arith.constant 0 : i32
    return %c0_i32, %c0_i32_0 : i32, i32
  }
  func.func @transform_7(%arg0: i32) -> (i32, i32) {
    %c0_i32 = arith.constant 0 : i32
    %c0_i32_0 = arith.constant 0 : i32
    return %arg0, %c0_i32 : i32, i32
  }
}

</mosaic_0001>

<bundles_post_ra>
// kernel: tpu_custom_call.1
= control target key start
LH: loop header
LB: loop body
LE: loop exit
PB: predicated region body
PF: predicated region fallthrough
CT: control target
= control target key end

     0   :  { %12 = vsyncpa [#allocation3], 0  ;;  %s672_s0 = inlined_call_operand.vmem [shape: f32[8,4], index: 0, kind: input, shape index: {}]   ;;  %s673_s1 = inlined_call_operand.vmem [shape: f32[4,128], index: 1, kind: input, shape index: {}]   ;;  %s674_s2 = inlined_call_operand.vmem [shape: f32[1,128], index: 2, kind: input, shape index: {}]   ;;  %s675_s3 = inlined_call_operand.hbm [shape: bf16[128,128], index: 3, kind: input, shape index: {}]   ;;  %s676_s4 = inlined_call_operand.vmem [shape: f32[1,128], index: 4, kind: input, shape index: {}]   ;;  %s677_s5 = inlined_call_operand.hbm [shape: bf16[128,128], index: 5, kind: input, shape index: {}]   ;;  %s678_s6 = inlined_call_operand.vmem [shape: f32[1,128], index: 6, kind: input, shape index: {}]   ;;  %s679_s7 = inlined_call_operand.vmem [shape: f32[8,2], index: 7, kind: output, shape index: {}]  }
   0x1   :  { %13 = vsyncpa [#allocation5], 0  ;;  %s561_s24 = smov [#allocation2]   ;;  %s513_s28 = scalar_lea.hbm %s675_s3, 1024 }
   0x2   :  { %s25_s25 = sshll.u32 %s561_s24, 4  ;;  %p514_p0 = scmp.ne.s32.totalorder %s675_s3, %s513_s28  ;;  %s26_s25 = int_to_ptr.vmem [resolvable:$true] %s25_s25 }
   0x3   :  { %p517_p1 = scmp.lt.u32.totalorder %s513_s28, %s675_s3 }
   0x5   :  { %p519_p2 = pnand %p517_p1, %p514_p0 }
   0x7   :  { %522 = shalt.err (!%p519_p2)
}
   0x8   :  { %s523_s10 = scalar_lea.vmem %s26_s25, 1024  ;;  %p528_p4 = scmp.lt.s32.totalorder %s26_s25, %s26_s25 }
   0x9   :  { %p524_p3 = scmp.ne.s32.totalorder %s26_s25, %s523_s10  ;;  %p529_p5 = scmp.lt.s32.totalorder %s523_s10, %s523_s10 }
   0xb   :  { %p530_p6 = por %p529_p5, %p528_p4 }
   0xd   :  { %p531_p7 = pnand %p530_p6, %p524_p3 }
   0xf   :  { %534 = shalt.err (!%p531_p7)
}
  0x10   :  { %s562_s11 = smov 64   ;;  %s563_s12 = smov 4  }
  0x11   :  { %31 = dma.hbm_to_vmem [thread:$0]  %s675_s3, 1024, %s26_s25, [#allocation3], %s562_s11, %s562_s11, %s563_s12  }
  0x12   :  { %s564_s15 = smov [#allocation4]   ;;  %s535_s19 = scalar_lea.hbm %s677_s5, 1024 }
  0x13   :  { %s39_s16 = sshll.u32 %s564_s15, 4  ;;  %p536_p8 = scmp.ne.s32.totalorder %s677_s5, %s535_s19  ;;  %s40_s16 = int_to_ptr.vmem [resolvable:$true] %s39_s16 }
  0x14   :  { %p539_p9 = scmp.lt.u32.totalorder %s535_s19, %s677_s5 }
  0x16   :  { %p541_p10 = pnand %p539_p9, %p536_p8 }
  0x18   :  { %544 = shalt.err (!%p541_p10)
}
  0x19   :  { %s545_s24 = scalar_lea.vmem %s40_s16, 1024  ;;  %p550_p12 = scmp.lt.s32.totalorder %s40_s16, %s40_s16 }
  0x1a   :  { %p546_p11 = scmp.ne.s32.totalorder %s40_s16, %s545_s24  ;;  %p551_p13 = scmp.lt.s32.totalorder %s545_s24, %s545_s24 }
  0x1c   :  { %p552_p0 = por %p551_p13, %p550_p12 }
  0x1e   :  { %p553_p1 = pnand %p552_p0, %p546_p11 }
  0x20   :  { %556 = shalt.err (!%p553_p1)
}
  0x21   :  { %45 = dma.hbm_to_vmem [thread:$0]  %s677_s5, 1024, %s40_s16, [#allocation5], %s562_s11, %s562_s11, %s563_s12  }
  0x22   :  { %557 = dma.done.wait [#allocation3], 1024  }
  0x23   :  { %558 = vsyncadd [#allocation3], 4294966272 }
  0x24   :  { %559 = dma.done.wait [#allocation5], 1024  }
  0x25   :  { %560 = vsyncadd [#allocation5], 4294966272  ;;  %v565_v0 = vmov 0.0   ;;  %vm566_vm0 = vmmov 0   ;;  %vm68_vm1 = vcmask 1043456   ;;  %vm64_vm2 = vcmask 31744  }
  0x26   :  { %438 = vmatprep.subr.mxu0 %v565_v0  ;;  %440 = vmatprep.mubr.msk.f32.mxu0 %vm566_vm0, %v565_v0  ;;  %v56_v1 = vld [vmem:[%s673_s1] sm:$0xf]  ;;  %v494_v4 = vld [vmem:[#allocation2 + $0x8] sm:$0xff]   ;;  %v495_v5 = vld [vmem:[#allocation2 + $0x10] sm:$0xff]   ;;  %v567_v33 = vmov 0   ;;  %s568_s9 = smov 127   ;;  %v373_v42 = vlaneseq }
  0x27   :  { %443 = vmatprep.subr.bf16.mxu1 %v565_v0  ;;  %459 = vmatprep.mubr.msk.bf16.mxu1 %vm566_vm0, %v565_v0  ;;  %v55_v2 = vld [vmem:[%s672_s0] sm:$0xff]  ;;  %v496_v6 = vld [vmem:[#allocation2 + $0x18] sm:$0xff]   ;;  %v498_v8 = vld [vmem:[#allocation2 + $0x28] sm:$0xff]   ;;  %v569_v44 = vmov -1.0   ;;  %vm389_vm4 = vcmask 15360  }
  0x28   :  { %439 = vmatpush3.msk.msra.mxu0 %vm68_vm1, %v56_v1  ;;  %v493_v3 = vld [vmem:[#allocation2] sm:$0xff]   ;;  %v499_v9 = vld [vmem:[#allocation2 + $0x30] sm:$0xff]   ;;  %v500_v10 = vld [vmem:[#allocation2 + $0x38] sm:$0xff]   ;;  %492 = vset.pattern.permute.xlu0 %v567_v33  ;;  %v374_v43 = vand.u32 127, %v373_v42 }
  0x29   :  { %441 = vmatmul.mubr.msk.f32.vlgmr.msra.gmra.mrb[0].mxu0 %vm64_vm2, %v55_v2  ;;  %463 = vmatprep.subr.bf16.mxu0 %v565_v0  ;;  %v497_v7 = vld [vmem:[#allocation2 + $0x20] sm:$0xff]   ;;  %v502_v12 = vld [vmem:[#allocation4 + $0x8] sm:$0xff]   ;;  %v503_v13 = vld [vmem:[#allocation4 + $0x10] sm:$0xff]  }
  0x2a   :  { %444 = vmatpush3.bf16.msra.mxu1 %v493_v3  ;;  %479 = vmatprep.mubr.msk.bf16.mxu0 %vm566_vm0, %v565_v0  ;;  %v501_v11 = vld [vmem:[#allocation4] sm:$0xff]   ;;  %v504_v14 = vld [vmem:[#allocation4 + $0x18] sm:$0xff]   ;;  %v506_v16 = vld [vmem:[#allocation4 + $0x28] sm:$0xff]   ;;  %vm375_vm3 = vcmp.eq.s32.totalorder %v374_v43, 0 }
  0x2b   :  { %445 = vmatprep.subr.bf16.mxu1 %v565_v0  ;;  %464 = vmatpush3.bf16.msra.mxu0 %v501_v11  ;;  %v505_v15 = vld [vmem:[#allocation4 + $0x20] sm:$0xff]   ;;  %v507_v23 = vld [vmem:[#allocation4 + $0x30] sm:$0xff]   ;;  %v508_v24 = vld [vmem:[#allocation4 + $0x38] sm:$0xff]   ;;  %v376_v45 = vsel %vm375_vm3, 1.0, %v569_v44 }
  0x2c   :  { %465 = vmatprep.subr.bf16.mxu0 %v565_v0  ;;  %v397_v17 = vld [vmem:[%s674_s2] ss:$0 sm:$0xff] }
  0x2d   :  { %v400_v25 = vld [vmem:[%s676_s4] ss:$0 sm:$0xff] }
  0x2e   :  { %446 = vmatpush3.bf16.msra.mxu1 %v494_v4  ;;  %v409_v34 = vld [vmem:[%s678_s6] ss:$0 sm:$0xff] }
  0x2f   :  { %447 = vmatprep.subr.bf16.mxu1 %v565_v0  ;;  %466 = vmatpush3.bf16.msra.mxu0 %v502_v12 }
  0x30   :  { %467 = vmatprep.subr.bf16.mxu0 %v565_v0 }
  0x32   :  { %448 = vmatpush3.bf16.msra.mxu1 %v495_v5 }
  0x33   :  { %449 = vmatprep.subr.bf16.mxu1 %v565_v0  ;;  %468 = vmatpush3.bf16.msra.mxu0 %v503_v13 }
  0x34   :  { %469 = vmatprep.subr.bf16.mxu0 %v565_v0 }
  0x36   :  { %450 = vmatpush3.bf16.msra.mxu1 %v496_v6 }
  0x37   :  { %451 = vmatprep.subr.bf16.mxu1 %v565_v0  ;;  %470 = vmatpush3.bf16.msra.mxu0 %v504_v14 }
  0x38   :  { %471 = vmatprep.subr.bf16.mxu0 %v565_v0 }
  0x3a   :  { %452 = vmatpush3.bf16.msra.mxu1 %v497_v7 }
  0x3b   :  { %453 = vmatprep.subr.bf16.mxu1 %v565_v0  ;;  %472 = vmatpush3.bf16.msra.mxu0 %v505_v15 }
  0x3c   :  { %473 = vmatprep.subr.bf16.mxu0 %v565_v0 }
  0x3e   :  { %454 = vmatpush3.bf16.msra.mxu1 %v498_v8 }
  0x3f   :  { %455 = vmatprep.subr.bf16.mxu1 %v565_v0  ;;  %474 = vmatpush3.bf16.msra.mxu0 %v506_v16 }
  0x40   :  { %475 = vmatprep.subr.bf16.mxu0 %v565_v0 }
  0x42   :  { %456 = vmatpush3.bf16.msra.mxu1 %v499_v9 }
  0x43   :  { %457 = vmatprep.subr.bf16.mxu1 %v565_v0  ;;  %476 = vmatpush3.bf16.msra.mxu0 %v507_v23 }
  0x44   :  { %477 = vmatprep.subr.bf16.mxu0 %v565_v0 }
  0x46   :  { %458 = vmatpush3.bf16.msra.mxu1 %v500_v10 }
  0x47   :  { %478 = vmatpush3.bf16.msra.mxu0 %v508_v24 }
  0xfc   :  { %v138_v18 = vpop.f32.mrb[0].mxu0 }
  0xfd   :  { %v139_v19 = vadd.f32 %v397_v17, %v138_v18  ;;  %v442_v20 = vpop.f32.mrb[1].mxu0 }
  0xff   :  { %v142_v21 = vmax.f32 %v139_v19, 0.0 }
 0x101   :  { %v143_v22 = vpack.c.bf16 %v142_v21, %v142_v21 }
 0x103   :  { %460 = vmatmul.mubr.bf16.vlgmr.msra.gmra.mrb[0].mxu1 %v143_v22 }
 0x1d6   :  { %v249_v26 = vpop.f32.mrb[0].mxu1 }
 0x1d7   :  { %v250_v27 = vadd.f32 %v400_v25, %v249_v26  ;;  %v461_v28 = vpop.f32.mrb[1].mxu1 }
 0x1d8   :  { %v252_v29 = vpop.f32.mrb[2].mxu1 }
 0x1d9   :  { %v255_v30 = vmax.f32 %v250_v27, 0.0  ;;  %v462_v31 = vpop.f32.mrb[3].mxu1 }
 0x1db   :  { %v256_v32 = vpack.c.bf16 %v255_v30, %v255_v30 }
 0x1dd   :  { %480 = vmatmul.mubr.bf16.vlgmr.msra.gmra.mrb[4].mxu0 %v256_v32 }
 0x2b0   :  { %v362_v35 = vpop.f32.mrb[4].mxu0 }
 0x2b1   :  { %v363_v36 = vadd.f32 %v409_v34, %v362_v35  ;;  %v481_v37 = vpop.f32.mrb[5].mxu0 }
 0x2b2   :  { %v365_v38 = vpop.f32.mrb[6].mxu0 }
 0x2b3   :  { %369 = vrot.lane.b32.xlu0 %v363_v36, %s568_s9  ;;  %v482_v39 = vpop.f32.mrb[7].mxu0 }
 0x325   :  { %v370_v40 = vpop.permute.xlu0 %369 }
 0x326   :  { %v372_v41 = vsub.f32 %v363_v36, %v370_v40 }
 0x328   :  { %379 = vperm.xlu0 %492, %v372_v41  }
 0x3a7   :  { %v380_v46 = vpop.permute.xlu0 %379 }
 0x3a8   :  { %v382_v47 = vmul.f32 %v380_v46, %v376_v45 }
 0x3aa   :  { %v383_v48 = vsub.f32 0.0, %v382_v47 }
 0x3ac   :  { %v384_v49 = vmul.f32 1.442695, %v383_v48 }
 0x3ae   :  { %509 = vpow2.f32 %v384_v49 }
 0x3b8   :  { %v510_v50 = vpop.eup %509 }
 0x3b9   :  { %v386_v51 = vadd.f32 1.0, %v510_v50 }
 0x3bb   :  { %511 = vrcp.f32 %v386_v51 }
 0x3c5   :  { %v512_v52 = vpop.eup %511 }
 0x3c6   :  { %390 = vst.msk [vmem:[%s679_s7] sm:$0xff] %vm389_vm4, %v512_v52 }
 0x3c7   :  { %395 = vsyncpa [#allocation3], 1 }
 0x3c8   :  { %396 = vsyncpa [#allocation5], 1 }

</bundles_post_ra>
